<compile_context>
chip_gen: v6e
topology: v6e:2x2x1
jax: 0.10.0
libtpu: 0.0.40
codegen_flags: <defaults>
</compile_context>

<pallas_src>
import jax
import jax.numpy as jnp
import numpy as np
from jax.experimental import pallas as pl
from jax.experimental.pallas import tpu as pltpu

_LANE = 128
_SUBLANE = 8
_MAX_ROWS_PER_BLOCK = 2048   # 2048 * 128 * 4 B = 1 MiB per f32 input per step


def _round_up(a, m):
    return ((a + m - 1) // m) * m


def _weighted_absdiff_partial_kernel(r_ref, x_ref, w_ref, o_ref):
    """One grid step: (TR, 128) rows of recons/x plus per-row weights (TR, 1).

    Emits sum over rows of w_row * |recons_row - x_row| as a vreg-shaped
    (1, 8, 128) partial; the cross-lane reduction happens in the wrapper.
    """
    diff = jnp.abs(r_ref[...].astype(jnp.float32) -
                   x_ref[...].astype(jnp.float32))
    weighted = diff * w_ref[...]                        # (TR,128) * (TR,1), VPU
    part = jnp.sum(weighted.reshape(-1, _SUBLANE, _LANE), axis=0)  # vreg adds
    o_ref[...] = part.reshape(1, _SUBLANE, _LANE)


def dual_recon_loss(recons, x, y, lambda_fake=1.0):
    """Pallas TPU implementation of DualReconLoss.forward.

    recons, x: (B, ...) float arrays of identical shape (f32 or bf16);
    y: (B,) int labels (1 = real, 0 = fake). Returns a float32 scalar.
    """
    assert recons.shape == x.shape
    B = x.shape[0]
    D = int(np.prod(x.shape[1:]))

    # ---- per-sample weights folding masks, counts, 1/D and lambda ---------
    y32 = y.astype(jnp.int32)
    is_real = (y32 == 1)
    is_fake = (y32 == 0)
    n_real = jnp.sum(is_real.astype(jnp.float32))
    n_fake = jnp.sum(is_fake.astype(jnp.float32))
    inv_real = jnp.where(n_real > 0,
                         1.0 / (jnp.maximum(n_real, 1.0) * D), 0.0)
    inv_fake = jnp.where(n_fake > 0,
                         jnp.float32(lambda_fake) / (jnp.maximum(n_fake, 1.0) * D),
                         0.0)
    # Labels outside {0, 1} get weight 0 (excluded from both means).
    w_sample = jnp.where(is_real, inv_real,
                         jnp.where(is_fake, -inv_fake, 0.0)).astype(jnp.float32)

    # ---- flatten to lane-dense rows of width 128, zero-pad as needed ------
    S = -(-D // _LANE)              # rows per sample
    D_pad = S * _LANE
    r_flat = recons.reshape(B, D)
    x_flat = x.reshape(B, D)
    if D_pad != D:
        pad = ((0, 0), (0, D_pad - D))
        r_flat = jnp.pad(r_flat, pad)
        x_flat = jnp.pad(x_flat, pad)
    r_rows = r_flat.reshape(B * S, _LANE)
    x_rows = x_flat.reshape(B * S, _LANE)
    w_rows = jnp.broadcast_to(w_sample[:, None], (B, S)).reshape(B * S)

    R = B * S
    TR = min(_MAX_ROWS_PER_BLOCK, _round_up(R, 2 * _SUBLANE))  # mult of 16 (bf16-safe)
    R_pad = _round_up(R, TR)
    if R_pad != R:
        r_rows = jnp.pad(r_rows, ((0, R_pad - R), (0, 0)))
        x_rows = jnp.pad(x_rows, ((0, R_pad - R), (0, 0)))
        w_rows = jnp.pad(w_rows, ((0, R_pad - R),))
    w_col = w_rows.reshape(R_pad, 1)

    G = R_pad // TR   # number of (fully parallel) grid steps

    partials = pl.pallas_call(
        _weighted_absdiff_partial_kernel,
        out_shape=jax.ShapeDtypeStruct((G, _SUBLANE, _LANE), jnp.float32),
        grid=(G,),
        in_specs=[
            pl.BlockSpec((TR, _LANE), lambda g: (g, 0)),   # recons rows
            pl.BlockSpec((TR, _LANE), lambda g: (g, 0)),   # x rows
            pl.BlockSpec((TR, 1), lambda g: (g, 0)),       # per-row weights
        ],
        out_specs=pl.BlockSpec((1, _SUBLANE, _LANE), lambda g: (g, 0, 0)),
        compiler_params=pltpu.CompilerParams(
            dimension_semantics=("parallel",),
        ),
    )(r_rows, x_rows, w_col)

    # Tiny epilogue reduce (G * 1024 f32 values) done by XLA.
    return jnp.sum(partials)


def _reference_loss(recons, x, y, lambda_fake=1.0):
    diff = jnp.abs(recons.astype(jnp.float32) - x.astype(jnp.float32))
    diff = diff.reshape(x.shape[0], -1)
    per_sample_mean = jnp.mean(diff, axis=-1)
    real_mask = (y == 1).astype(jnp.float32)
    fake_mask = (y == 0).astype(jnp.float32)
    nr = jnp.sum(real_mask)
    nf = jnp.sum(fake_mask)
    loss_real = jnp.where(
        nr > 0, jnp.sum(per_sample_mean * real_mask) / jnp.maximum(nr, 1.0), 0.0)
    loss_fake = jnp.where(
        nf > 0, jnp.sum(per_sample_mean * fake_mask) / jnp.maximum(nf, 1.0), 0.0)
    return loss_real - loss_fake * lambda_fake


if __name__ == "__main__":
    key = jax.random.PRNGKey(0)
    k1, k2, k3, k4 = jax.random.split(key, 4)

    # Test 1: batch=4, channels=4, spatial=16x16 (D = 1024).
    B, C, H, W = 4, 4, 16, 16
    x = jax.random.normal(k1, (B, C, H, W), dtype=jnp.float32)
    recons = jax.random.normal(k2, (B, C, H, W), dtype=jnp.float32)
    y = jnp.array([1, 0, 1, 0], dtype=jnp.int32)

    loss = jax.block_until_ready(dual_recon_loss(recons, x, y, lambda_fake=1.0))
    ref = jax.block_until_ready(_reference_loss(recons, x, y, lambda_fake=1.0))
    np.testing.assert_allclose(np.asarray(loss), np.asarray(ref),
                               rtol=1e-5, atol=1e-5)

    # Test 2: odd feature count (exercises the zero-padding path), a missing
    # class (no real samples), and lambda != 1.
    B2, C2, H2, W2 = 2, 3, 15, 15      # D = 675, not a multiple of 128
    x2 = jax.random.normal(k3, (B2, C2, H2, W2), dtype=jnp.float32)
    r2 = jax.random.normal(k4, (B2, C2, H2, W2), dtype=jnp.float32)
    y2 = jnp.array([0, 0], dtype=jnp.int32)

    loss2 = jax.block_until_ready(dual_recon_loss(r2, x2, y2, lambda_fake=0.5))
    ref2 = jax.block_until_ready(_reference_loss(r2, x2, y2, lambda_fake=0.5))
    np.testing.assert_allclose(np.asarray(loss2), np.asarray(ref2),
                               rtol=1e-5, atol=1e-5)

    print("KERNEL_OK")
</pallas_src>

<mosaic_0001>
module attributes {stable_mosaic.version = 11 : i64} {
  func.func @_weighted_absdiff_partial_kernel(%arg0: i32, %arg1: memref<32x128xf32, #tpu.memory_space<vmem>>, %arg2: memref<32x128xf32, #tpu.memory_space<vmem>>, %arg3: memref<32x1xf32, #tpu.memory_space<vmem>>, %arg4: memref<1x8x128xf32, #tpu.memory_space<vmem>>) attributes {dimension_semantics = [#tpu.dimension_semantics<parallel>], iteration_bounds = array<i64: 1>, scalar_prefetch = 0 : i64, scratch_operands = 0 : i64, tpu.core_type = #tpu.core_type<tc>, window_params = [{transform_indices = @transform_0, window_bounds = array<i64: 32, 128>}, {transform_indices = @transform_1, window_bounds = array<i64: 32, 128>}, {transform_indices = @transform_2, window_bounds = array<i64: 32, 1>}, {transform_indices = @transform_3, window_bounds = array<i64: 1, 8, 128>}]} {
    %c0 = arith.constant 0 : index
    %c0_0 = arith.constant 0 : index
    %0 = vector.load %arg1[%c0, %c0_0] : memref<32x128xf32, #tpu.memory_space<vmem>>, vector<32x128xf32>
    %c0_1 = arith.constant 0 : index
    %c0_2 = arith.constant 0 : index
    %1 = vector.load %arg2[%c0_1, %c0_2] : memref<32x128xf32, #tpu.memory_space<vmem>>, vector<32x128xf32>
    %2 = arith.subf %0, %1 : vector<32x128xf32>
    %3 = math.absf %2 : vector<32x128xf32>
    %c0_3 = arith.constant 0 : index
    %c0_4 = arith.constant 0 : index
    %4 = vector.load %arg3[%c0_3, %c0_4] : memref<32x1xf32, #tpu.memory_space<vmem>>, vector<32x1xf32>
    %5 = vector.broadcast %4 : vector<32x1xf32> to vector<32x128xf32>
    %6 = arith.mulf %3, %5 : vector<32x128xf32>
    %7 = vector.shape_cast %6 : vector<32x128xf32> to vector<4x8x128xf32>
    %cst = arith.constant dense<0.000000e+00> : vector<8x128xf32>
    %8 = vector.multi_reduction <add>, %7, %cst [0] : vector<4x8x128xf32> to vector<8x128xf32>
    %9 = vector.shape_cast %8 : vector<8x128xf32> to vector<1x8x128xf32>
    %c0_5 = arith.constant 0 : index
    %c0_6 = arith.constant 0 : index
    %c0_7 = arith.constant 0 : index
    %10 = vector.load %arg4[%c0_5, %c0_6, %c0_7] : memref<1x8x128xf32, #tpu.memory_space<vmem>>, vector<1x8x128xf32>
    tpu.vector_store %arg4[%c0_5, %c0_6, %c0_7], %9 {strides = array<i32>} : memref<1x8x128xf32, #tpu.memory_space<vmem>>, vector<1x8x128xf32>,
    return
  }
  func.func @transform_0(%arg0: i32) -> (i32, i32) {
    %c0_i32 = arith.constant 0 : i32
    %c0_i32_0 = arith.constant 0 : i32
    return %arg0, %c0_i32 : i32, i32
  }
  func.func @transform_1(%arg0: i32) -> (i32, i32) {
    %c0_i32 = arith.constant 0 : i32
    %c0_i32_0 = arith.constant 0 : i32
    return %arg0, %c0_i32 : i32, i32
  }
  func.func @transform_2(%arg0: i32) -> (i32, i32) {
    %c0_i32 = arith.constant 0 : i32
    %c0_i32_0 = arith.constant 0 : i32
    return %arg0, %c0_i32 : i32, i32
  }
  func.func @transform_3(%arg0: i32) -> (i32, i32, i32) {
    %c0_i32 = arith.constant 0 : i32
    %c0_i32_0 = arith.constant 0 : i32
    %c0_i32_1 = arith.constant 0 : i32
    return %arg0, %c0_i32, %c0_i32_0 : i32, i32, i32
  }
}

</mosaic_0001>

<bundles_post_ra>
// kernel: tpu_custom_call.1
= control target key start
LH: loop header
LB: loop body
LE: loop exit
PB: predicated region body
PF: predicated region fallthrough
CT: control target
= control target key end

     0   :  { %8 = vsyncpa [#allocation3], 0  ;;  %s198_s0 = inlined_call_operand.vmem [shape: f32[32,128], index: 0, kind: input, shape index: {}]   ;;  %s199_s1 = inlined_call_operand.hbm [shape: f32[32,128], index: 1, kind: input, shape index: {}]   ;;  %s200_s2 = inlined_call_operand.vmem [shape: f32[32,1], index: 2, kind: input, shape index: {}]   ;;  %s201_s3 = inlined_call_operand.hbm [shape: f32[1,8,128], index: 3, kind: output, shape index: {}]  }
   0x1   :  { %9 = vsyncpa [#allocation4], 0  ;;  %s143_s12 = smov [#allocation2]  }
   0x2   :  { %s17_s13 = sshll.u32 %s143_s12, 4  ;;  %s18_s13 = int_to_ptr.vmem [resolvable:$true] %s17_s13 }
   0x3   :  { %s107_s14 = scalar_lea.vmem %s18_s13, 512  ;;  %p112_p1 = scmp.lt.s32.totalorder %s18_s13, %s18_s13 }
   0x4   :  { %p108_p0 = scmp.ne.s32.totalorder %s18_s13, %s107_s14  ;;  %p113_p2 = scmp.lt.s32.totalorder %s107_s14, %s107_s14 }
   0x6   :  { %p114_p3 = por %p113_p2, %p112_p1 }
   0x8   :  { %p115_p4 = pnand %p114_p3, %p108_p0 }
   0xa   :  { %118 = shalt.err (!%p115_p4)
}
   0xb   :  { %s144_s15 = smov 128   ;;  %s145_s16 = smov 8  }
   0xc   :  { %23 = dma.hbm_to_vmem [thread:$0]  %s199_s1, 512, %s18_s13, [#allocation3], %s144_s15, %s144_s15, %s145_s16  }
   0xd   :  { %139 = dma.done.wait [#allocation3], 512  }
   0xe   :  { %140 = vsyncadd [#allocation3], 4294966784  ;;  %v146_v0 = vmov 0   ;;  %v47_v1 = vld [vmem:[%s200_s2 + $0x10] sm:$0xff]  ;;  %v45_v2 = vld [vmem:[%s200_s2] sm:$0xff]  ;;  %s147_s6 = smov [#allocation5]  }
   0xf   :  { %98 = vset.pattern.permute.xlu1 %v146_v0  ;;  %97 = vset.pattern.permute.xlu0 %v146_v0  ;;  %v48_v3 = vld [vmem:[%s200_s2 + $0x18] sm:$0xff]  ;;  %v46_v4 = vld [vmem:[%s200_s2 + $0x8] sm:$0xff]  ;;  %v29_v5 = vld [vmem:[%s198_s0] sm:$0xff]  ;;  %s83_s7 = sshll.u32 %s147_s6, 4  ;;  %s84_s7 = int_to_ptr.vmem [resolvable:$true] %s83_s7 }
  0x10   :  { %61 = vperm.xlu1 %98, %v47_v1   ;;  %51 = vperm.xlu0 %97, %v45_v2   ;;  %v33_v6 = vld [vmem:[#allocation2] sm:$0xff]  ;;  %v30_v7 = vld [vmem:[%s198_s0 + $0x8] sm:$0xff]  ;;  %v31_v9 = vld [vmem:[%s198_s0 + $0x10] sm:$0xff]  ;;  %p124_p6 = scmp.lt.s32.totalorder %s84_s7, %s84_s7 }
  0x11   :  { %v34_v8 = vld [vmem:[#allocation2 + $0x8] sm:$0xff]  ;;  %v35_v10 = vld [vmem:[#allocation2 + $0x10] sm:$0xff]  ;;  %v37_v11 = vsub.f32 %v29_v5, %v33_v6  ;;  %v32_v13 = vld [vmem:[%s198_s0 + $0x18] sm:$0xff]  ;;  %s119_s0 = scalar_lea.vmem %s84_s7, 128 }
  0x12   :  { %v38_v12 = vsub.f32 %v30_v7, %v34_v8  ;;  %v36_v14 = vld [vmem:[#allocation2 + $0x18] sm:$0xff]  ;;  %v39_v15 = vsub.f32 %v31_v9, %v35_v10  ;;  %p120_p5 = scmp.ne.s32.totalorder %s84_s7, %s119_s0  ;;  %p125_p7 = scmp.lt.s32.totalorder %s119_s0, %s119_s0 }
  0x13   :  { %v41_v18 = vand.u32 2147483647, %v37_v11  ;;  %v40_v19 = vsub.f32 %v32_v13, %v36_v14 }
  0x14   :  { %66 = vperm.xlu1 %98, %v48_v3   ;;  %56 = vperm.xlu0 %97, %v46_v4   ;;  %v42_v20 = vand.u32 2147483647, %v38_v12  ;;  %v43_v21 = vand.u32 2147483647, %v39_v15  ;;  %p126_p8 = por %p125_p7, %p124_p6 }
  0x15   :  { %v44_v24 = vand.u32 2147483647, %v40_v19 }
  0x16   :  { %p127_p9 = pnand %p126_p8, %p120_p5 }
  0x8b   :  { %v62_v16 = vpop.permute.xlu1 %61  ;;  %v52_v17 = vpop.permute.xlu0 %51 }
  0x8c   :  { %v69_v23 = vmul.f32 %v52_v17, %v41_v18  ;;  %v71_v27 = vmul.f32 %v62_v16, %v43_v21 }
  0x8f   :  { %v57_v22 = vpop.permute.xlu0 %56  ;;  %v67_v26 = vpop.permute.xlu1 %66 }
  0x90   :  { %v70_v25 = vmul.f32 %v57_v22, %v42_v20  ;;  %v72_v29 = vmul.f32 %v67_v26, %v44_v24 }
  0x92   :  { %v73_v28 = vadd.f32 %v70_v25, %v69_v23 }
  0x94   :  { %v74_v30 = vadd.f32 %v73_v28, %v71_v27 }
  0x96   :  { %v75_v31 = vadd.f32 %v74_v30, %v72_v29 }
  0x98   :  { %76 = vst [vmem:[#allocation5] sm:$0xff] %v75_v31 }
  0x99   :  { %130 = shalt.err (!%p127_p9)
}
  0x9a   :  { %86 = dma.vmem_to_hbm [thread:$0]  %s84_s7, 128, %s201_s3, [#allocation4]  }
  0x9b   :  { %141 = dma.done.wait [#allocation4], 128  }
  0x9c   :  { %142 = vsyncadd [#allocation4], 4294967168 }
  0x9d   :  { %90 = vsyncpa [#allocation3], 1 }
  0x9e   :  { %91 = vsyncpa [#allocation4], 1 }

</bundles_post_ra>
